<compile_context>
chip_gen: v6e
topology: v6e:2x2x1
jax: 0.10.0
libtpu: 0.0.40
codegen_flags: <defaults>
</compile_context>

<pallas_src>
import jax
import jax.numpy as jnp
from jax.experimental import pallas as pl
from jax.experimental.pallas import tpu as pltpu


def _round_up(x, m):
    return ((x + m - 1) // m) * m


def sage_conv_kernel(self_ref, adj_ref, feat_ref, w_ref, o_ref, acc_ref, deg_ref):
    """One (row-tile i, neighbor-tile k) step of GraphSAGE aggregation."""
    k = pl.program_id(1)
    f = feat_ref.shape[-1]

    @pl.when(k == 0)
    def _init():
        acc_ref[...] = jnp.zeros_like(acc_ref)
        deg_ref[...] = jnp.zeros_like(deg_ref)

    adj = adj_ref[...]                                    # (TN, TK) bf16, 0/1 exact
    # MXU: bf16 x bf16 -> f32 accumulation of  sum_k adj[:, k-tile] @ feat[k-tile]
    acc_ref[...] += jnp.dot(adj, feat_ref[...],
                            preferred_element_type=jnp.float32)
    # Degree must be accumulated across K tiles (not recomputed per tile).
    deg_ref[...] += jnp.sum(adj.astype(jnp.float32), axis=-1, keepdims=True)

    @pl.when(k == pl.num_programs(1) - 1)
    def _finalize():
        # 1/(deg+1) on the EUP slot (approx reciprocal is essentially free).
        inv = pl.reciprocal(deg_ref[...] + 1.0, approx=True)         # (TN, 1)
        # cat([self, neigh]) @ W == self @ W[:F] + neigh @ W[F:], and
        # neigh @ W[F:] == inv * (agg @ W[F:])  (per-row scale commutes),
        # so the scale is applied to the smaller (TN, D_out) tensor.
        out = jnp.dot(self_ref[...], w_ref[0:f, :],
                      preferred_element_type=jnp.float32)
        out = out + inv * jnp.dot(acc_ref[...], w_ref[f:2 * f, :],
                                  preferred_element_type=jnp.float32)
        o_ref[...] = out.astype(o_ref.dtype)


def _vmem_bytes(tn, tk, f, d_out):
    """Rough per-step VMEM footprint (double-buffered streaming operands)."""
    adj = 2 * tn * tk * 2            # bf16 adjacency tile
    agg_feat = 2 * tk * f * 2        # bf16 aggregation features
    self_feat = 2 * tn * f * 4       # f32 self features
    w = 2 * (2 * f) * d_out * 4      # f32 weight (grid-invariant)
    out = 2 * tn * d_out * 4         # f32 output tile
    acc = tn * f * 4                 # f32 accumulator scratch
    deg = tn * 128 * 4               # f32 degree scratch (lane-padded)
    return adj + agg_feat + self_feat + w + out + acc + deg


def _pow2_tile(requested, n):
    """Largest power-of-two multiple of 128 <= min(requested, round_up(n,128))."""
    limit = max(128, min(requested, _round_up(n, 128)))
    t = 128
    while t * 2 <= limit:
        t *= 2
    return t


def sage_conv_forward(features, adj, weight, *, block_rows=256, block_cols=1024,
                      vmem_budget_bytes=36 * 2**20):
    """GraphSAGE layer forward (dense 2-D adjacency path).

    features: (N, F) float32
    adj:      (N, N) dense 0/1 adjacency (any float dtype; cast to bf16)
    weight:   (2F, D_out) float32 -- transpose of torch's nn.Linear weight.
    """
    n, f = features.shape
    assert adj.shape == (n, n), "dense square adjacency expected"
    assert weight.shape[0] == 2 * f, "weight must be (2*in_features, out_features)"
    d_out = weight.shape[1]
    assert f % 128 == 0 and d_out % 128 == 0, (
        "in/out feature dims must be multiples of 128 (lane-dense tiles)")
    # TODO(synk): pad non-128-aligned feature dims instead of asserting.

    # Tile selection: pow2 multiples of 128, shrunk to fit the VMEM budget
    # (budget chosen so tiles fit v7x's 64 MiB with headroom).
    tn = _pow2_tile(block_rows, n)
    tk = _pow2_tile(block_cols, n)
    while _vmem_bytes(tn, tk, f, d_out) > vmem_budget_bytes and tk > 128:
        tk //= 2
    while _vmem_bytes(tn, tk, f, d_out) > vmem_budget_bytes and tn > 128:
        tn //= 2

    n_pad = _round_up(n, max(tn, tk))     # tn, tk are pow2*128 => both divide n_pad
    pad = n_pad - n

    feats32 = features.astype(jnp.float32)
    if pad:
        feats32 = jnp.pad(feats32, ((0, pad), (0, 0)))
        adj = jnp.pad(adj, ((0, pad), (0, pad)))
    # Adjacency + aggregation-side features in bf16 (exact for 0/1 adjacency);
    # in production the adjacency should already be stored bf16 in HBM.
    adj_bf16 = adj.astype(jnp.bfloat16)
    feats_bf16 = feats32.astype(jnp.bfloat16)

    grid = (n_pad // tn, n_pad // tk)

    out = pl.pallas_call(
        sage_conv_kernel,
        out_shape=jax.ShapeDtypeStruct((n_pad, d_out), jnp.float32),
        grid=grid,
        in_specs=[
            pl.BlockSpec((tn, f), lambda i, k: (i, 0)),          # self feats (f32)
            pl.BlockSpec((tn, tk), lambda i, k: (i, k)),         # adj tile (bf16)
            pl.BlockSpec((tk, f), lambda i, k: (k, 0)),          # agg feats (bf16)
            pl.BlockSpec((2 * f, d_out), lambda i, k: (0, 0)),   # weight (f32)
        ],
        out_specs=pl.BlockSpec((tn, d_out), lambda i, k: (i, 0)),
        scratch_shapes=[
            pltpu.VMEM((tn, f), jnp.float32),    # neighbor-sum accumulator
            pltpu.VMEM((tn, 1), jnp.float32),    # degree accumulator
        ],
        compiler_params=pltpu.CompilerParams(
            dimension_semantics=("parallel", "arbitrary"),
            vmem_limit_bytes=48 * 2**20),
    )(feats32, adj_bf16, feats_bf16, weight.astype(jnp.float32))

    return out[:n] if pad else out


if __name__ == "__main__":
    # Small, lane-aligned shapes: 256 nodes, 128 input features, 128 outputs.
    n_nodes, in_features, out_features = 256, 128, 128

    key = jax.random.PRNGKey(0)
    k_feat, k_adj, k_w = jax.random.split(key, 3)

    features = jax.random.normal(k_feat, (n_nodes, in_features), jnp.float32)
    # Random dense 0/1 adjacency (~10% density).
    adj = (jax.random.uniform(k_adj, (n_nodes, n_nodes)) < 0.1).astype(jnp.float32)
    # proj.weight ~ N(0, 1) per reset_parameters(); stored transposed (2F, D_out).
    weight = jax.random.normal(k_w, (2 * in_features, out_features), jnp.float32)

    # Small tiles so the demo exercises the full (i, k) accumulator pipeline:
    # grid = (2, 2).
    out = sage_conv_forward(features, adj, weight, block_rows=128, block_cols=128)
    jax.block_until_ready(out)

    # Plain-JAX f32 reference with the module's exact math (dense 2-D path).
    deg = adj.sum(axis=1, keepdims=True)
    neigh = (adj @ features) / (deg + 1.0)
    ref = jnp.concatenate([features, neigh], axis=-1) @ weight

    assert out.shape == (n_nodes, out_features)
    # bf16 aggregation features + approx reciprocal => slightly loosened check.
    max_err = float(jnp.max(jnp.abs(out - ref)))
    tol = 2e-2 * float(jnp.max(jnp.abs(ref))) + 5e-2
    assert max_err <= tol, f"mismatch vs reference: max_err={max_err}, tol={tol}"

    print("KERNEL_OK")
</pallas_src>

<mosaic_0001>
module attributes {stable_mosaic.version = 11 : i64} {
  func.func @sage_conv_kernel(%arg0: i32, %arg1: i32, %arg2: memref<128x128xf32, #tpu.memory_space<vmem>>, %arg3: memref<128x128xbf16, #tpu.memory_space<vmem>>, %arg4: memref<128x128xbf16, #tpu.memory_space<vmem>>, %arg5: memref<256x128xf32, #tpu.memory_space<vmem>>, %arg6: memref<128x128xf32, #tpu.memory_space<vmem>>, %arg7: memref<128x128xf32, #tpu.memory_space<vmem>>, %arg8: memref<128x1xf32, #tpu.memory_space<vmem>>) attributes {dimension_semantics = [#tpu.dimension_semantics<parallel>, #tpu.dimension_semantics<arbitrary>], iteration_bounds = array<i64: 2, 2>, scalar_prefetch = 0 : i64, scratch_operands = 2 : i64, tpu.core_type = #tpu.core_type<tc>, window_params = [{transform_indices = @transform_0, window_bounds = array<i64: 128, 128>}, {transform_indices = @transform_1, window_bounds = array<i64: 128, 128>}, {transform_indices = @transform_2, window_bounds = array<i64: 128, 128>}, {pipeline_mode = #tpu.pipeline_mode<synchronous>, transform_indices = @transform_3, window_bounds = array<i64: 256, 128>}, {transform_indices = @transform_4, window_bounds = array<i64: 128, 128>}]} {
    %c0_i32 = arith.constant 0 : i32
    %0 = arith.cmpi eq, %arg1, %c0_i32 : i32
    %1 = arith.extui %0 : i1 to i32
    %c0_i32_0 = arith.constant 0 : i32
    %2 = arith.cmpi ne, %1, %c0_i32_0 : i32
    scf.if %2 {
      %cst_14 = arith.constant 0.000000e+00 : f32
      %18 = vector.broadcast %cst_14 : f32 to vector<128x128xf32>
      %c0_15 = arith.constant 0 : index
      %c0_16 = arith.constant 0 : index
      %19 = vector.load %arg7[%c0_15, %c0_16] : memref<128x128xf32, #tpu.memory_space<vmem>>, vector<128x128xf32>
      tpu.vector_store %arg7[%c0_15, %c0_16], %18 {strides = array<i32>} : memref<128x128xf32, #tpu.memory_space<vmem>>, vector<128x128xf32>,
      %cst_17 = arith.constant 0.000000e+00 : f32
      %20 = vector.broadcast %cst_17 : f32 to vector<128x1xf32>
      %c0_18 = arith.constant 0 : index
      %c0_19 = arith.constant 0 : index
      %21 = vector.load %arg8[%c0_18, %c0_19] : memref<128x1xf32, #tpu.memory_space<vmem>>, vector<128x1xf32>
      tpu.vector_store %arg8[%c0_18, %c0_19], %20 {strides = array<i32>} : memref<128x1xf32, #tpu.memory_space<vmem>>, vector<128x1xf32>,
    } else {
    }
    %c0 = arith.constant 0 : index
    %c0_1 = arith.constant 0 : index
    %3 = vector.load %arg3[%c0, %c0_1] : memref<128x128xbf16, #tpu.memory_space<vmem>>, vector<128x128xbf16>
    %c0_2 = arith.constant 0 : index
    %c0_3 = arith.constant 0 : index
    %4 = vector.load %arg7[%c0_2, %c0_3] : memref<128x128xf32, #tpu.memory_space<vmem>>, vector<128x128xf32>
    %c0_4 = arith.constant 0 : index
    %c0_5 = arith.constant 0 : index
    %5 = vector.load %arg4[%c0_4, %c0_5] : memref<128x128xbf16, #tpu.memory_space<vmem>>, vector<128x128xbf16>
    %cst = arith.constant dense<0.000000e+00> : vector<128x128xf32>
    %6 = tpu.matmul %3, %5, %cst {dimension_numbers = #tpu.dot_dimension_numbers<[1], [0], [0], [1], [0, 0, 1, 1], [], []>} : vector<128x128xbf16>, vector<128x128xbf16>, vector<128x128xf32> -> vector<128x128xf32>
    %7 = arith.addf %4, %6 : vector<128x128xf32>
    %c0_6 = arith.constant 0 : index
    %c0_7 = arith.constant 0 : index
    %8 = vector.load %arg7[%c0_6, %c0_7] : memref<128x128xf32, #tpu.memory_space<vmem>>, vector<128x128xf32>
    tpu.vector_store %arg7[%c0_6, %c0_7], %7 {strides = array<i32>} : memref<128x128xf32, #tpu.memory_space<vmem>>, vector<128x128xf32>,
    %c0_8 = arith.constant 0 : index
    %c0_9 = arith.constant 0 : index
    %9 = vector.load %arg8[%c0_8, %c0_9] : memref<128x1xf32, #tpu.memory_space<vmem>>, vector<128x1xf32>
    %10 = arith.extf %3 : vector<128x128xbf16> to vector<128x128xf32>
    %cst_10 = arith.constant dense<0.000000e+00> : vector<128xf32>
    %11 = vector.multi_reduction <add>, %10, %cst_10 [1] : vector<128x128xf32> to vector<128xf32>
    %12 = vector.shape_cast %11 : vector<128xf32> to vector<128x1xf32>
    %13 = arith.addf %9, %12 : vector<128x1xf32>
    %c0_11 = arith.constant 0 : index
    %c0_12 = arith.constant 0 : index
    %14 = vector.load %arg8[%c0_11, %c0_12] : memref<128x1xf32, #tpu.memory_space<vmem>>, vector<128x1xf32>
    tpu.vector_store %arg8[%c0_11, %c0_12], %13 {strides = array<i32>} : memref<128x1xf32, #tpu.memory_space<vmem>>, vector<128x1xf32>,
    %c1_i32 = arith.constant 1 : i32
    %15 = arith.cmpi eq, %arg1, %c1_i32 : i32
    %16 = arith.extui %15 : i1 to i32
    %c0_i32_13 = arith.constant 0 : i32
    %17 = arith.cmpi ne, %16, %c0_i32_13 : i32
    scf.if %17 {
      %c0_14 = arith.constant 0 : index
      %c0_15 = arith.constant 0 : index
      %18 = vector.load %arg8[%c0_14, %c0_15] : memref<128x1xf32, #tpu.memory_space<vmem>>, vector<128x1xf32>
      %cst_16 = arith.constant 1.000000e+00 : f32
      %19 = vector.broadcast %cst_16 : f32 to vector<128x1xf32>
      %20 = arith.addf %18, %19 : vector<128x1xf32>
      %21 = tpu.reciprocal %20 {approx = true} : vector<128x1xf32> -> vector<128x1xf32>
      %c0_17 = arith.constant 0 : index
      %c0_18 = arith.constant 0 : index
      %22 = vector.load %arg2[%c0_17, %c0_18] : memref<128x128xf32, #tpu.memory_space<vmem>>, vector<128x128xf32>
      %c0_19 = arith.constant 0 : index
      %c0_20 = arith.constant 0 : index
      %23 = vector.load %arg5[%c0_19, %c0_20] : memref<256x128xf32, #tpu.memory_space<vmem>>, vector<128x128xf32>
      %cst_21 = arith.constant dense<0.000000e+00> : vector<128x128xf32>
      %24 = tpu.matmul %22, %23, %cst_21 {dimension_numbers = #tpu.dot_dimension_numbers<[1], [0], [0], [1], [0, 0, 1, 1], [], []>} : vector<128x128xf32>, vector<128x128xf32>, vector<128x128xf32> -> vector<128x128xf32>
      %c0_22 = arith.constant 0 : index
      %c0_23 = arith.constant 0 : index
      %25 = vector.load %arg7[%c0_22, %c0_23] : memref<128x128xf32, #tpu.memory_space<vmem>>, vector<128x128xf32>
      %c128 = arith.constant 128 : index
      %c0_24 = arith.constant 0 : index
      %26 = vector.load %arg5[%c128, %c0_24] : memref<256x128xf32, #tpu.memory_space<vmem>>, vector<128x128xf32>
      %cst_25 = arith.constant dense<0.000000e+00> : vector<128x128xf32>
      %27 = tpu.matmul %25, %26, %cst_25 {dimension_numbers = #tpu.dot_dimension_numbers<[1], [0], [0], [1], [0, 0, 1, 1], [], []>} : vector<128x128xf32>, vector<128x128xf32>, vector<128x128xf32> -> vector<128x128xf32>
      %28 = vector.broadcast %21 : vector<128x1xf32> to vector<128x128xf32>
      %29 = arith.mulf %28, %27 : vector<128x128xf32>
      %30 = arith.addf %24, %29 : vector<128x128xf32>
      %c0_26 = arith.constant 0 : index
      %c0_27 = arith.constant 0 : index
      %31 = vector.load %arg6[%c0_26, %c0_27] : memref<128x128xf32, #tpu.memory_space<vmem>>, vector<128x128xf32>
      tpu.vector_store %arg6[%c0_26, %c0_27], %30 {strides = array<i32>} : memref<128x128xf32, #tpu.memory_space<vmem>>, vector<128x128xf32>,
    } else {
    }
    return
  }
  func.func @transform_0(%arg0: i32, %arg1: i32) -> (i32, i32) {
    %c0_i32 = arith.constant 0 : i32
    %c0_i32_0 = arith.constant 0 : i32
    return %arg0, %c0_i32 : i32, i32
  }
  func.func @transform_1(%arg0: i32, %arg1: i32) -> (i32, i32) {
    %c0_i32 = arith.constant 0 : i32
    return %arg0, %arg1 : i32, i32
  }
  func.func @transform_2(%arg0: i32, %arg1: i32) -> (i32, i32) {
    %c0_i32 = arith.constant 0 : i32
    %c0_i32_0 = arith.constant 0 : i32
    return %arg1, %c0_i32 : i32, i32
  }
  func.func @transform_3(%arg0: i32, %arg1: i32) -> (i32, i32) {
    %c0_i32 = arith.constant 0 : i32
    %c0_i32_0 = arith.constant 0 : i32
    %c0_i32_1 = arith.constant 0 : i32
    return %c0_i32, %c0_i32_0 : i32, i32
  }
  func.func @transform_4(%arg0: i32, %arg1: i32) -> (i32, i32) {
    %c0_i32 = arith.constant 0 : i32
    %c0_i32_0 = arith.constant 0 : i32
    return %arg0, %c0_i32 : i32, i32
  }
}

</mosaic_0001>

<bundles_post_ra>
// kernel: tpu_custom_call.1
= control target key start
LH: loop header
LB: loop body
LE: loop exit
PB: predicated region body
PF: predicated region fallthrough
CT: control target
= control target key end

     0   :  { %s2656_s0 = inlined_call_operand.hbm [shape: f32[256,128], index: 0, kind: input, shape index: {}]   ;;  %s2657_s1 = inlined_call_operand.hbm [shape: bf16[256,256], index: 1, kind: input, shape index: {}]   ;;  %s2658_s2 = inlined_call_operand.hbm [shape: bf16[256,128], index: 2, kind: input, shape index: {}]   ;;  %s2659_s3 = inlined_call_operand.hbm [shape: f32[256,128], index: 3, kind: input, shape index: {}]   ;;  %s2660_s4 = inlined_call_operand.hbm [shape: f32[256,128], index: 4, kind: output, shape index: {}]  }
   0x1   :  { %2674 = sst [smem:[#allocation28_spill]] %s2656_s0 }
   0x2   :  { %2675 = sst [smem:[#allocation29_spill]] %s2657_s1 }
   0x3   :  { %2676 = sst [smem:[#allocation30_spill]] %s2658_s2 }
   0x4   :  { %2677 = sst [smem:[#allocation31_spill]] %s2659_s3 }
   0x5   :  { %2678 = sst [smem:[#allocation32_spill]] %s2660_s4 }
   0x6   :  { %9 = vsyncpa [#allocation5], 0 }
   0x7   :  { %11 = vsyncpa [#allocation5 + $0x1], 0 }
   0x8   :  { %12 = vsyncpa [#allocation8], 0 }
   0x9   :  { %14 = vsyncpa [#allocation8 + $0x1], 0 }
   0xa   :  { %15 = vsyncpa [#allocation11], 0 }
   0xb   :  { %16 = vsyncpa [#allocation6], 0 }
   0xc   :  { %18 = vsyncpa [#allocation6 + $0x1], 0  ;;  %s2214_s15 = smov 0   ;;  %s2216_s16 = smov 0  }
   0xd   :  { %s2218_s17 = smov 0   ;;  %s2220_s18 = smov 0  }
   0xe   :  { %s2222_s19 = smov 0   ;;  %s2224_s20 = smov 0  }
   0xf   :  { %s2226_s21 = smov 0   ;;  %s2228_s22 = smov 0  }
  0x10   :  { %s2230_s23 = smov 0   ;;  %s2232_s24 = smov 0  }
  0x11   :  { %s2234_s25 = smov 0   ;;  %s2236_s26 = smov 0  }
  0x12   :  { %s2238_s27 = smov 0   ;;  %s2240_s28 = smov 0  }
  0x13 LB: > { %2679 = sst [smem:[#allocation18_spill]] %s2122_s15  ;;  %s33_s29 = sadd.s32 1, %s2166_s26  ;;  %s2174_s28 = sphi %s2240_s28, %s24_s28   ;;  %s2170_s27 = sphi %s2238_s27, %s2741_s27   ;;  %s2166_s26 = sphi %s2236_s26, %s2740_s26   ;;  %s2162_s25 = sphi %s2234_s25, %s2739_s25   ;;  %s2158_s24 = sphi %s2232_s24, %s2738_s24   ;;  %s2154_s23 = sphi %s2230_s23, %s2727_s23   ;;  %s2150_s22 = sphi %s2228_s22, %s2737_s22   ;;  %s2146_s21 = sphi %s2226_s21, %s2736_s21   ;;  %s2142_s20 = sphi %s2224_s20, %s2735_s20   ;;  %s2138_s19 = sphi %s2222_s19, %s2734_s19   ;;  %s2134_s18 = sphi %s2220_s18, %s2733_s18   ;;  %s2130_s17 = sphi %s2218_s17, %s2732_s17   ;;  %s2126_s16 = sphi %s2216_s16, %s2731_s16   ;;  %s2122_s15 = sphi %s2214_s15, %s2724_s15  }
  0x14   : > { %2680 = sst [smem:[#allocation19_spill]] %s2126_s16  ;;  %s36_s30 = sadd.s32 1, %s2170_s27 }
  0x15   : > { %2681 = sst [smem:[#allocation20_spill]] %s2154_s23  ;;  %p34_p0 = scmp.ge.s32.totalorder %s33_s29, 2 }
  0x16   : > { %2682 = sst [smem:[#allocation21_spill]] %s2158_s24  ;;  %p2672_p1 = scmp.eq.s32.totalorder %s2174_s28, 0 }
  0x17   : > { %2683 = sst [smem:[#allocation22_spill]] %s2162_s25  ;;  %s71_s5 = sadd.s32 1, %s2142_s20 }
  0x18   : > { %2684 = sst [smem:[#allocation23_spill]] %s2170_s27  ;;  %p78_p2 = scmp.ne.s32.totalorder %s2142_s20, %s2138_s19 }
  0x19   : > { %s2743_s29 = smov (%p34_p0, %s33_s29), 0  ;;  %s2745_s30 = smov (!%p34_p0, %s36_s30), %s2170_s27 }
  0x1a   : > { %2685 = sst [smem:[#allocation24_spill]] %s2743_s29  ;;  %s2295_s6 = ssub.s32 %s2166_s26, %s2743_s29 }
  0x1b   : > { %p2299_p3 = por %p78_p2, %p2672_p1  ;;  %p38_p4 = scmp.ge.s32.totalorder %s2745_s30, 2 }
  0x1c   : > { %p84_p5 = scmp.ne.s32.totalorder %s2138_s19, %s2134_s18  ;;  %p2665_p7 = scmp.lt.s32.totalorder %s2174_s28, 4 }
  0x1d   : > { %s2747_s30 = smov (%p38_p4, %s2745_s30), 0  ;;  %s215_s9 = sand.u32 1, %s2174_s28  }
  0x1e   : > { %2687 = sst [smem:[#allocation25_spill]] %s2747_s30  ;;  %s2311_s8 = ssub.s32 %s2170_s27, %s2747_s30 }
  0x1f   : > { %s68_s10 = sor.u32 %s2295_s6, %s2311_s8  ;;  %s217_s11 = sand.u32 1, %s2142_s20  }
  0x20   : > { %p69_p8 = scmp.eq.s32.totalorder %s68_s10, 0  ;;  %s1415_s12 = sshll.u32 %s217_s11, 6 }
  0x21   : > { %s1452_s13 = sshll.u32 %s2170_s27, 5  ;;  %s219_s25 = scalar_lea.vmem [#allocation7], %s1415_s12 }
  0x22   : > { %s2319_s14 = scalar_select %p69_p8, %s2142_s20, %s71_s5  }
  0x23   : > { %s225_s29 = sadd.s32 %s2166_s26, %s1452_s13  ;;  %s228_s24 = sshll.u32 %s219_s25, 4  ;;  %s229_s24 = int_to_ptr.vmem [resolvable:$true] %s228_s24 }
  0x24   : > { %2688 = sst [smem:[#allocation26_spill]] %s2319_s14  ;;  %s1418_s4 = sshll.u32 %s225_s29, 6 }
  0x25   : > { %s2689_s1 = sld [smem:[#allocation29_spill]]  ;;  %p2329_p9 = pnand %p2665_p7, %p2299_p3 }
  0x26   : > { %s2333_s10 = scalar_lea.sflag [#allocation8], %s215_s9  ;;  %s1921_s5 = scalar_lea.vmem %s229_s24, 1024 }
  0x27   : > { %p1910_p10 = pneg %p2329_p9  ;;  %p1922_p11 = scmp.ne.s32.totalorder %s229_s24, %s1921_s5 }
  0x28   : > { %s2176_s25 = smov [#allocation7]  }
  0x29   : > { %p1924_p12 = pnand %p1922_p11, %p1910_p10  ;;  %s1926_s29 = sshll.u32 %s2176_s25, 4  ;;  %s1927_s29 = int_to_ptr.vmem [resolvable:$false] %s1926_s29 }
  0x2a   : > { %s1928_s2 = scalar_lea.vmem %s1927_s29, 2048  ;;  %p1929_p0 = scmp.lt.s32.totalorder %s229_s24, %s1927_s29 }
  0x2b   : > { %s227_s16 = scalar_lea.hbm %s2689_s1, %s1418_s4  ;;  %p1925_p13 = pneg %p1924_p12 }
  0x2c   : > { %p1930_p2 = scmp.lt.s32.totalorder %s1928_s2, %s1921_s5 }
  0x2e   : > { %p1931_p4 = por %p1930_p2, %p1929_p0 }
  0x30   : > { %p1932_p3 = pnand %p1931_p4, %p1925_p13 }
  0x32   : > { %1935 = shalt.err (!%p1932_p3)
}
  0x33   : > { %s2668_s4 = smov 128   ;;  %s2666_s15 = smov 64  }
  0x34   : > { %s2667_s7 = smov 4   ;;  %s2344_s9 = sadd.s32 4294967295, %s2174_s28  }
  0x35   : > { %1717 = dma.hbm_to_vmem [thread:$0]  (!%p2329_p9), %s227_s16, 1024, %s229_s24, %s2333_s10, %s2668_s4, %s2666_s15, %s2667_s7  }
  0x36   : > { %p1409_p8 = scmp.ge.s32.totalorder %s2174_s28, 1  ;;  %p2671_p10 = scmp.eq.s32.totalorder %s2344_s9, 0 }
  0x37   : > { %p168_p12 = scmp.lt.s32.totalorder %s2174_s28, 5  ;;  %s2180_s16 = smov [#allocation10]  }
  0x38   : > { %p2355_p13 = por %p84_p5, %p2671_p10  ;;  %s180_s24 = sshll.u32 %s2180_s16, 4  ;;  %s181_s24 = int_to_ptr.vmem [resolvable:$true] %s180_s24 }
  0x39   : > { %p2359_p0 = pnand %p1409_p8, %p168_p12  ;;  %s1408_s12 = sadd.s32 4294967294, %s2174_s28  }
  0x3a   : > { %s1947_s13 = scalar_lea.vmem %s181_s24, 4096  ;;  %p1955_p7 = scmp.lt.s32.totalorder %s181_s24, %s181_s24 }
  0x3b   : > { %p1707_p9 = pneg %p2359_p0  ;;  %p1948_p3 = scmp.ne.s32.totalorder %s181_s24, %s1947_s13 }
  0x3c   : > { %p1956_p11 = scmp.lt.s32.totalorder %s1947_s13, %s1947_s13 }
  0x3d   : > { %p1708_p2 = pnand %p1707_p9, %p2671_p10 }
  0x3e   : > { %p1957_p8 = por %p1956_p11, %p1955_p7 }
  0x3f   : > { %p1938_p4 = pneg %p1708_p2 }
  0x41   : > { %p1950_p5 = pnand %p1948_p3, %p1938_p4 }
  0x43   : > { %p1951_p6 = pneg %p1950_p5 }
  0x45   : > { %p1958_p12 = pnand %p1957_p8, %p1951_p6 }
  0x47   : > { %1961 = shalt.err (!%p1958_p12)
}
  0x48   : > { %s2669_s18 = smov 8   ;;  %s2693_s3 = sld [smem:[#allocation31_spill]] }
  0x49   : > { %p41_p6 = scmp.eq.s32.totalorder %s2311_s8, 0  ;;  %s43_s29 = sadd.s32 1, %s2154_s23 }
  0x4a   : > { %p50_p7 = scmp.ne.s32.totalorder %s2154_s23, %s2150_s22  ;;  %p56_p11 = scmp.ne.s32.totalorder %s2150_s22, %s2146_s21 }
  0x4b   : > { %s2381_s2 = scalar_select %p41_p6, %s2154_s23, %s43_s29  }
  0x4c   : > { %p52_p9 = por %p2672_p1, %p50_p7  ;;  %p2387_p4 = por %p2671_p10, %p56_p11 }
  0x4d   : > { %2694 = sst [smem:[#allocation27_spill]] %s2381_s2  ;;  %p2696_p3 = scmp.eq.s32.totalorder %s2344_s9, 3 }
  0x4e   : > { %1710 = dma.hbm_to_vmem [thread:$0]  (!%p1708_p2), %s2693_s3, 4096, %s181_s24, [#allocation11], %s2668_s4, %s2668_s4, %s2669_s18  }
  0x4f   : > { %p2393_p5 = por %p2696_p3, %p50_p7  ;;  %p161_p8 = scmp.eq.s32.totalorder %s1408_s12, 3 }
  0x50   : > { %s194_s24 = sand.u32 1, %s2154_s23   ;;  %s1451_s8 = sshll.u32 %s2170_s27, 11 }
  0x51   : > { %p2399_p2 = por %p161_p8, %p56_p11  ;;  %s1412_s25 = sshll.u32 %s194_s24, 7 }
  0x52   : > { %s2699_s0 = sld [smem:[#allocation28_spill]]  ;;  %p2700_p12 = scmp.lt.s32.totalorder %s2174_s28, 4 }
  0x53   : > { %s2698_s5 = scalar_select %p2399_p2, 1, 0 }
  0x54   : > { %p2408_p6 = pnand %p2700_p12, %p52_p9  ;;  %s198_s18 = scalar_lea.vmem [#allocation4], %s1412_s25 }
  0x55   : > { %s205_s1 = sshll.u32 %s198_s18, 4  ;;  %s195_s12 = scalar_lea.sflag [#allocation5], %s194_s24  ;;  %s206_s1 = int_to_ptr.vmem [resolvable:$true] %s205_s1 }
  0x56   : > { %p1964_p7 = pneg %p2408_p6  ;;  %s1975_s3 = scalar_lea.vmem %s206_s1, 2048 }
  0x57   : > { %p1976_p11 = scmp.ne.s32.totalorder %s206_s1, %s1975_s3  ;;  %s2182_s27 = smov [#allocation4]  }
  0x58   : > { %s204_s7 = scalar_lea.hbm %s2699_s0, %s1451_s8  ;;  %s1980_s2 = sshll.u32 %s2182_s27, 4  ;;  %s1981_s2 = int_to_ptr.vmem [resolvable:$false] %s1980_s2 }
  0x59   : > { %p1978_p3 = pnand %p1976_p11, %p1964_p7  ;;  %s1982_s15 = scalar_lea.vmem %s1981_s2, 4096 }
  0x5a   : > { %p1983_p10 = scmp.lt.s32.totalorder %s206_s1, %s1981_s2  ;;  %p1984_p9 = scmp.lt.s32.totalorder %s1982_s15, %s1975_s3 }
  0x5b   : > { %p1979_p8 = pneg %p1978_p3 }
  0x5c   : > { %p1985_p12 = por %p1984_p9, %p1983_p10 }
  0x5e   : > { %p1986_p1 = pnand %p1985_p12, %p1979_p8 }
  0x60   : > { %1989 = shalt.err (!%p1986_p1)
}
  0x61   : > { %s2702_s18 = smov 8   ;;  %s2703_s8 = smov 128  }
  0x62   : > { %s2704_s24 = sld [smem:[#allocation19_spill]]  ;;  %s97_s3 = sadd.s32 1, %s2130_s17 }
  0x63   : > { %s2705_s25 = sld [smem:[#allocation18_spill]]  ;;  %p2706_p1 = scmp.eq.s32.totalorder %s2295_s6, 0 }
  0x64   : > { %1714 = dma.hbm_to_vmem [thread:$0]  (!%p2408_p6), %s204_s7, 2048, %s206_s1, %s195_s12, %s2703_s8, %s2703_s8, %s2702_s18  }
  0x65   : > { %s2423_s27 = scalar_select %p2706_p1, %s2130_s17, %s97_s3  }
  0x66   : > { %s240_s4 = sand.u32 1, %s2130_s17   ;;  %s1453_s2 = sshll.u32 %s2166_s26, 10 }
  0x67   : > { %p2707_p11 = scmp.eq.s32.totalorder %s2174_s28, 0  ;;  %p2708_p8 = scmp.eq.s32.totalorder %s2344_s9, 0 }
  0x68   : > { %p104_p10 = scmp.ne.s32.totalorder %s2130_s17, %s2704_s24  ;;  %s1419_s15 = sshll.u32 %s240_s4, 6 }
  0x69   : > { %p110_p7 = scmp.ne.s32.totalorder %s2704_s24, %s2705_s25  ;;  %s2710_s14 = sld [smem:[#allocation30_spill]] }
  0x6a   : > { %p106_p3 = por %p104_p10, %p2707_p11  ;;  %p2711_p6 = scmp.lt.s32.totalorder %s2174_s28, 4 }
  0x6b   : > { %p2435_p9 = por %p110_p7, %p2708_p8  ;;  %s242_s7 = scalar_lea.vmem [#allocation9], %s1419_s15 }
  0x6c   : > { %p2444_p12 = pnand %p2711_p6, %p106_p3  ;;  %s249_s12 = sshll.u32 %s242_s7, 4  ;;  %s250_s12 = int_to_ptr.vmem [resolvable:$true] %s249_s12 }
  0x6d   : > { %s2003_s18 = scalar_lea.vmem %s250_s12, 1024  ;;  %s2183_s8 = smov [#allocation9]  }
  0x6e   : > { %p1992_p1 = pneg %p2444_p12  ;;  %p2004_p10 = scmp.ne.s32.totalorder %s250_s12, %s2003_s18 }
  0x6f   : > { %s248_s1 = scalar_lea.hbm %s2710_s14, %s1453_s2  ;;  %s2008_s24 = sshll.u32 %s2183_s8, 4  ;;  %s2009_s24 = int_to_ptr.vmem [resolvable:$false] %s2008_s24 }
  0x70   : > { %p2006_p7 = pnand %p2004_p10, %p1992_p1  ;;  %s2010_s0 = scalar_lea.vmem %s2009_s24, 2048 }
  0x71   : > { %p2011_p8 = scmp.lt.s32.totalorder %s250_s12, %s2009_s24  ;;  %p2012_p2 = scmp.lt.s32.totalorder %s2010_s0, %s2003_s18 }
  0x72   : > { %p2007_p11 = pneg %p2006_p7 }
  0x73   : > { %p2013_p3 = por %p2012_p2, %p2011_p8 }
  0x75   : > { %p2014_p6 = pnand %p2013_p3, %p2007_p11 }
  0x77   : > { %2017 = shalt.err (!%p2014_p6)
}
  0x78   : > { %s2713_s23 = smov 4   ;;  %s2714_s14 = smov 64  }
  0x79   : > { %1720 = dma.hbm_to_vmem [thread:$0]  (!%p2444_p12), %s248_s1, 1024, %s250_s12, %s2333_s10, %s2714_s14, %s2714_s14, %s2713_s23  }
  0x7a   : > { %261 = sbr.rel (%p2359_p0) target bundleno = 705 (0x2c1), region = 36  ;;  %s2459_s25 = sand.u32 (!%p2359_p0), 1, %s2150_s22  }
  0x7b   : > { %s1423_s3 = sshll.u32 (!%p2359_p0), %s2459_s25, 7  ;;  %s264_s4 = scalar_lea.sflag (!%p2359_p0), [#allocation5], %s2459_s25 }
  0x7c   : > { %s2463_s2 = scalar_lea.vmem (!%p2359_p0), [#allocation4], %s1423_s3 }
  0x7f   : > { %2101 = dma.done.wait (%p2387_p4), %s264_s4, 2048  }
  0x80   : > { %2103 = vsyncadd (%p2387_p4), %s264_s4, 4294965248  ;;  %s272_s10 = sand.u32 1, %s2344_s9   ;;  %s274_s30 = sand.u32 1, %s2138_s19  }
  0x81   : > { %s1424_s15 = sshll.u32 %s274_s30, 6  ;;  %s273_s1 = scalar_lea.sflag [#allocation8], %s272_s10 }
  0x82   : > { %s2471_s6 = scalar_lea.vmem [#allocation7], %s1424_s15 }
  0x83   : > { %2105 = dma.done.wait (%p2355_p13), %s273_s1, 1024  }
  0x84   : > { %2107 = vsyncadd (%p2355_p13), %s273_s1, 4294966272  ;;  %s2715_s7 = sld [smem:[#allocation19_spill]] }
  0x8a   : > { %s283_s12 = sand.u32 1, %s2715_s7  }
  0x8b   : > { %s1425_s18 = sshll.u32 %s283_s12, 6 }
  0x8c   : > { %s2478_s16 = scalar_lea.vmem [#allocation9], %s1425_s18 }
  0x8d   : > { %2109 = dma.done.wait (%p2435_p9), %s273_s1, 1024  }
  0x8e   : > { %2111 = vsyncadd (%p2435_p9), %s273_s1, 4294966272  ;;  %p2716_p0 = scmp.eq.s32.totalorder %s2344_s9, 0 }
  0x90   : > { %2113 = dma.done.wait (%p2716_p0), [#allocation11], 4096   ;;  %p2717_p4 = pmov %p2716_p0 }
  0x91   : > { %s2488_s8 = scalar_lea.vmem [#allocation12], %s1423_s3  ;;  %s2718_s11 = sld [smem:[#allocation21_spill]] }
  0x92   : > { %2115 = vsyncadd (%p2717_p4), [#allocation11], 4294963200 }
  0x97   : > { %p1428_p13 = scmp.ne.s32.totalorder %s2718_s11, 0 }
  0x99   : > { %332 = sbr.rel (%p1428_p13) target bundleno = 175 (0xaf), region = 56 }
  0x9e   : > { %vm349_vm0 = vcmask 7168   ;;  %v2184_v0 = vmov 0.0  }
  0x9f   : > { %333 = vst [vmem:[#allocation2 + $0x30] sm:$0xff] %v2184_v0  ;;  %334 = vst [vmem:[#allocation2] sm:$0xff] %v2184_v0 }
  0xa0   : > { %335 = vst [vmem:[#allocation2 + $0x58] sm:$0xff] %v2184_v0  ;;  %336 = vst [vmem:[#allocation2 + $0x18] sm:$0xff] %v2184_v0 }
  0xa1   : > { %337 = vst [vmem:[#allocation2 + $0x50] sm:$0xff] %v2184_v0  ;;  %338 = vst [vmem:[#allocation2 + $0x68] sm:$0xff] %v2184_v0 }
  0xa2   : > { %339 = vst [vmem:[#allocation2 + $0x8] sm:$0xff] %v2184_v0  ;;  %340 = vst [vmem:[#allocation2 + $0x48] sm:$0xff] %v2184_v0 }
  0xa3   : > { %341 = vst [vmem:[#allocation2 + $0x40] sm:$0xff] %v2184_v0  ;;  %342 = vst [vmem:[#allocation2 + $0x20] sm:$0xff] %v2184_v0 }
  0xa4   : > { %343 = vst [vmem:[#allocation2 + $0x10] sm:$0xff] %v2184_v0  ;;  %344 = vst [vmem:[#allocation2 + $0x38] sm:$0xff] %v2184_v0 }
  0xa5   : > { %345 = vst [vmem:[#allocation2 + $0x60] sm:$0xff] %v2184_v0  ;;  %346 = vst [vmem:[#allocation2 + $0x70] sm:$0xff] %v2184_v0 }
  0xa6   : > { %347 = vst [vmem:[#allocation2 + $0x78] sm:$0xff] %v2184_v0  ;;  %348 = vst [vmem:[#allocation2 + $0x28] sm:$0xff] %v2184_v0 }
  0xa7   : > { %350 = vst.msk [vmem:[#allocation3] sm:$0xff] %vm349_vm0, %v2184_v0  ;;  %351 = vst.msk [vmem:[#allocation3 + $0x8] sm:$0xff] %vm349_vm0, %v2184_v0 }
  0xa8   : > { %352 = vst.msk [vmem:[#allocation3 + $0x10] sm:$0xff] %vm349_vm0, %v2184_v0  ;;  %353 = vst.msk [vmem:[#allocation3 + $0x18] sm:$0xff] %vm349_vm0, %v2184_v0 }
  0xa9   : > { %354 = vst.msk [vmem:[#allocation3 + $0x20] sm:$0xff] %vm349_vm0, %v2184_v0  ;;  %355 = vst.msk [vmem:[#allocation3 + $0x28] sm:$0xff] %vm349_vm0, %v2184_v0 }
  0xaa   : > { %356 = vst.msk [vmem:[#allocation3 + $0x30] sm:$0xff] %vm349_vm0, %v2184_v0  ;;  %357 = vst.msk [vmem:[#allocation3 + $0x38] sm:$0xff] %vm349_vm0, %v2184_v0 }
  0xab   : > { %358 = vst.msk [vmem:[#allocation3 + $0x40] sm:$0xff] %vm349_vm0, %v2184_v0  ;;  %359 = vst.msk [vmem:[#allocation3 + $0x48] sm:$0xff] %vm349_vm0, %v2184_v0 }
  0xac   : > { %360 = vst.msk [vmem:[#allocation3 + $0x50] sm:$0xff] %vm349_vm0, %v2184_v0  ;;  %361 = vst.msk [vmem:[#allocation3 + $0x58] sm:$0xff] %vm349_vm0, %v2184_v0 }
  0xad   : > { %362 = vst.msk [vmem:[#allocation3 + $0x60] sm:$0xff] %vm349_vm0, %v2184_v0  ;;  %363 = vst.msk [vmem:[#allocation3 + $0x68] sm:$0xff] %vm349_vm0, %v2184_v0 }
  0xae   : > { %364 = vst.msk [vmem:[#allocation3 + $0x70] sm:$0xff] %vm349_vm0, %v2184_v0  ;;  %365 = vst.msk [vmem:[#allocation3 + $0x78] sm:$0xff] %vm349_vm0, %v2184_v0 }
  0xaf PF: > { %v1850_v1 = vld [vmem:[%s2478_s16 + $0x38] sm:$0xff]   ;;  %v1851_v2 = vld [vmem:[%s2478_s16 + $0x30] sm:$0xff]   ;;  %v1852_v3 = vld [vmem:[%s2478_s16 + $0x28] sm:$0xff]   ;;  %vm719_vm1 = vcmask 7168   ;;  %s2719_s9 = sld [smem:[#allocation21_spill]] }
  0xb0   : > { %1535 = vmatprep.subr.bf16.mxu0 %v1850_v1  ;;  %1679 = vmatprep.subr.bf16.mxu1 %v1850_v1  ;;  %v1853_v4 = vld [vmem:[%s2478_s16 + $0x20] sm:$0xff]   ;;  %v368_v7 = vld [vmem:[%s2471_s6 + $0x8] sm:$0xff]   ;;  %v1854_v10 = vld [vmem:[%s2478_s16 + $0x18] sm:$0xff]  }
  0xb1   : > { %1536 = vmatpush3.bf16.msra.mxu0 %v1850_v1  ;;  %1687 = vmatpush3.bf16.msra.mxu1 %v1850_v1  ;;  %v366_v5 = vld [vmem:[%s2471_s6] sm:$0xff]   ;;  %v657_v8 = vunpack.c.l.bf16 %v368_v7  ;;  %v658_v11 = vunpack.c.h.bf16 %v368_v7  ;;  %v1855_v13 = vld [vmem:[%s2478_s16 + $0x10] sm:$0xff]   ;;  %v1856_v17 = vld [vmem:[%s2478_s16 + $0x8] sm:$0xff]  }
  0xb2   : > { %1537 = vmatprep.subr.bf16.mxu0 %v1851_v2  ;;  %1680 = vmatprep.subr.bf16.mxu1 %v1851_v2  ;;  %v374_v6 = vld [vmem:[%s2471_s6 + $0x20] sm:$0xff]   ;;  %v655_v9 = vunpack.c.l.bf16 %v366_v5  ;;  %v656_v12 = vunpack.c.h.bf16 %v366_v5  ;;  %v370_v14 = vld [vmem:[%s2471_s6 + $0x10] sm:$0xff]   ;;  %v372_v18 = vld [vmem:[%s2471_s6 + $0x18] sm:$0xff]  }
  0xb3   : > { %1551 = vmatprep.mubr.bf16.mxu0 %v366_v5  ;;  %1559 = vmatprep.mubr.bf16.mxu1 %v374_v6  ;;  %v660_v15 = vunpack.c.h.bf16 %v370_v14  ;;  %v659_v16 = vunpack.c.l.bf16 %v370_v14  ;;  %v662_v19 = vunpack.c.h.bf16 %v372_v18  ;;  %v661_v20 = vunpack.c.l.bf16 %v372_v18  ;;  %v1857_v21 = vld [vmem:[%s2478_s16] sm:$0xff]   ;;  %v376_v24 = vld [vmem:[%s2471_s6 + $0x28] sm:$0xff]   ;;  %v378_v25 = vld [vmem:[%s2471_s6 + $0x30] sm:$0xff]  }
  0xb4   : > { %675 = vadd.xlane.f32.xlu1 %v657_v8  ;;  %671 = vadd.xlane.f32.xlu0 %v655_v9  ;;  %v664_v22 = vunpack.c.h.bf16 %v374_v6  ;;  %v663_v23 = vunpack.c.l.bf16 %v374_v6  ;;  %v666_v26 = vunpack.c.h.bf16 %v376_v24  ;;  %v665_v27 = vunpack.c.l.bf16 %v376_v24  ;;  %v380_v28 = vld [vmem:[%s2471_s6 + $0x38] sm:$0xff]   ;;  %v641_v33 = vld [vmem:[#allocation3 + $0x10] sm:$0xff]  ;;  %v639_v34 = vld [vmem:[#allocation3] sm:$0xff] }
  0xb5   : > { %1538 = vmatpush3.bf16.msra.mxu0 %v1851_v2  ;;  %1688 = vmatpush3.bf16.msra.mxu1 %v1851_v2  ;;  %v668_v29 = vunpack.c.h.bf16 %v378_v25  ;;  %v667_v30 = vunpack.c.l.bf16 %v378_v25  ;;  %v670_v31 = vunpack.c.h.bf16 %v380_v28  ;;  %v669_v32 = vunpack.c.l.bf16 %v380_v28  ;;  %v642_v39 = vld [vmem:[#allocation3 + $0x18] sm:$0xff]  ;;  %v640_v40 = vld [vmem:[#allocation3 + $0x8] sm:$0xff]  ;;  %v643_v46 = vld [vmem:[#allocation3 + $0x20] sm:$0xff]  ;;  %p1445_p2 = scmp.ne.s32.totalorder %s2719_s9, 1 }
  0xb6   : > { %1539 = vmatprep.subr.bf16.mxu0 %v1852_v3  ;;  %1681 = vmatprep.subr.bf16.mxu1 %v1852_v3  ;;  %v644_v45 = vld [vmem:[#allocation3 + $0x28] sm:$0xff]  ;;  %v646_v51 = vld [vmem:[#allocation3 + $0x38] sm:$0xff]  ;;  %v645_v52 = vld [vmem:[#allocation3 + $0x30] sm:$0xff] }
  0xb7   : > { %v648_v57 = vld [vmem:[#allocation3 + $0x48] sm:$0xff]  ;;  %v647_v58 = vld [vmem:[#allocation3 + $0x40] sm:$0xff]  ;;  %v650_v63 = vld [vmem:[#allocation3 + $0x58] sm:$0xff] }
  0xb8   : > { %677 = vadd.xlane.f32.xlu1 %v658_v11  ;;  %673 = vadd.xlane.f32.xlu0 %v656_v12  ;;  %v649_v0 = vld [vmem:[#allocation3 + $0x50] sm:$0xff]  ;;  %v652_v5 = vld [vmem:[#allocation3 + $0x68] sm:$0xff]  ;;  %v651_v6 = vld [vmem:[#allocation3 + $0x60] sm:$0xff] }
  0xb9   : > { %1540 = vmatpush3.bf16.msra.mxu0 %v1852_v3  ;;  %1689 = vmatpush3.bf16.msra.mxu1 %v1852_v3  ;;  %v654_v11 = vld [vmem:[#allocation3 + $0x78] sm:$0xff]  ;;  %v653_v12 = vld [vmem:[#allocation3 + $0x70] sm:$0xff] }
  0xba   : > { %1541 = vmatprep.subr.bf16.mxu0 %v1853_v4  ;;  %1682 = vmatprep.subr.bf16.mxu1 %v1853_v4 }
  0xbc   : > { %681 = vadd.xlane.f32.xlu1 %v660_v15  ;;  %679 = vadd.xlane.f32.xlu0 %v659_v16 }
  0xbd   : > { %1542 = vmatpush3.bf16.msra.mxu0 %v1853_v4  ;;  %1690 = vmatpush3.bf16.msra.mxu1 %v1853_v4 }
  0xbe   : > { %1543 = vmatprep.subr.bf16.mxu0 %v1854_v10  ;;  %1683 = vmatprep.subr.bf16.mxu1 %v1854_v10 }
  0xc0   : > { %685 = vadd.xlane.f32.xlu1 %v662_v19  ;;  %683 = vadd.xlane.f32.xlu0 %v661_v20 }
  0xc1   : > { %1544 = vmatpush3.bf16.msra.mxu0 %v1854_v10  ;;  %1691 = vmatpush3.bf16.msra.mxu1 %v1854_v10 }
  0xc2   : > { %1545 = vmatprep.subr.bf16.mxu0 %v1855_v13  ;;  %1684 = vmatprep.subr.bf16.mxu1 %v1855_v13 }
  0xc4   : > { %689 = vadd.xlane.f32.xlu1 %v664_v22  ;;  %687 = vadd.xlane.f32.xlu0 %v663_v23  ;;  %v382_v22 = vld [vmem:[#allocation2 + $0x30] sm:$0xff] }
  0xc5   : > { %1546 = vmatpush3.bf16.msra.mxu0 %v1855_v13  ;;  %1692 = vmatpush3.bf16.msra.mxu1 %v1855_v13 }
  0xc6   : > { %1547 = vmatprep.subr.bf16.mxu0 %v1856_v17  ;;  %1685 = vmatprep.subr.bf16.mxu1 %v1856_v17 }
  0xc8   : > { %693 = vadd.xlane.f32.xlu1 %v666_v26  ;;  %691 = vadd.xlane.f32.xlu0 %v665_v27  ;;  %v385_v27 = vld [vmem:[#allocation2 + $0x18] sm:$0xff] }
  0xc9   : > { %1548 = vmatpush3.bf16.msra.mxu0 %v1856_v17  ;;  %1693 = vmatpush3.bf16.msra.mxu1 %v1856_v17  ;;  %v384_v17 = vld [vmem:[#allocation2 + $0x58] sm:$0xff] }
  0xca   : > { %1549 = vmatprep.subr.bf16.mxu0 %v1857_v21  ;;  %1686 = vmatprep.subr.bf16.mxu1 %v1857_v21 }
  0xcc   : > { %697 = vadd.xlane.f32.xlu1 %v668_v29  ;;  %695 = vadd.xlane.f32.xlu0 %v667_v30 }
  0xcd   : > { %1550 = vmatpush3.bf16.msra.mxu0 %v1857_v21  ;;  %1694 = vmatpush3.bf16.msra.mxu1 %v1857_v21  ;;  %v390_v21 = vld [vmem:[#allocation2 + $0x40] sm:$0xff] }
  0xd0   : > { %1552 = vmatmul.mubr.bf16.vlgmr.msra.gmra.mxu0 %v368_v7  ;;  %1560 = vmatmul.mubr.bf16.vlgmr.msra.gmra.mxu1 %v376_v24 }
  0xd1   : > { %1555 = vmatprep.mubr.bf16.mxu0 %v370_v14  ;;  %1563 = vmatprep.mubr.bf16.mxu1 %v378_v25 }
  0xd2   : > { %701 = vadd.xlane.f32.xlu1 %v670_v31  ;;  %699 = vadd.xlane.f32.xlu0 %v669_v32 }
  0xd8   : > { %1556 = vmatmul.mubr.bf16.gmra.mxu0 %v372_v18  ;;  %1564 = vmatmul.mubr.bf16.gmra.mxu1 %v380_v28  ;;  %v392_v18 = vld [vmem:[#allocation2 + $0x10] sm:$0xff]  ;;  %v393_v28 = vld [vmem:[#allocation2 + $0x38] sm:$0xff] }
 0x13d   : > { %v676_v35 = vpop.xlane.xlu1 %675  ;;  %v672_v36 = vpop.xlane.xlu0 %671 }
 0x13e   : > { %v705_v37 = vadd.f32 %v676_v35, %v641_v33  ;;  %v703_v38 = vadd.f32 %v672_v36, %v639_v34  ;;  %v391_v33 = vld [vmem:[#allocation2 + $0x20] sm:$0xff] }
 0x13f   : > { %v383_v34 = vld [vmem:[#allocation2] sm:$0xff] }
 0x140   : > { %722 = vst.msk [vmem:[#allocation3 + $0x10] sm:$0xff] %vm719_vm1, %v705_v37  ;;  %720 = vst.msk [vmem:[#allocation3] sm:$0xff] %vm719_vm1, %v703_v38 }
 0x141   : > { %v678_v41 = vpop.xlane.xlu1 %677  ;;  %v674_v42 = vpop.xlane.xlu0 %673 }
 0x142   : > { %v706_v43 = vadd.f32 %v678_v41, %v642_v39  ;;  %v704_v44 = vadd.f32 %v674_v42, %v640_v40  ;;  %v388_v39 = vld [vmem:[#allocation2 + $0x8] sm:$0xff]  ;;  %v396_v40 = vld [vmem:[#allocation2 + $0x78] sm:$0xff] }
 0x144   : > { %723 = vst.msk [vmem:[#allocation3 + $0x18] sm:$0xff] %vm719_vm1, %v706_v43  ;;  %721 = vst.msk [vmem:[#allocation3 + $0x8] sm:$0xff] %vm719_vm1, %v704_v44 }
 0x145   : > { %v682_v47 = vpop.xlane.xlu1 %681  ;;  %v680_v48 = vpop.xlane.xlu0 %679 }
 0x146   : > { %v708_v49 = vadd.f32 %v682_v47, %v644_v45  ;;  %v707_v50 = vadd.f32 %v680_v48, %v643_v46  ;;  %v394_v45 = vld [vmem:[#allocation2 + $0x60] sm:$0xff]  ;;  %v386_v46 = vld [vmem:[#allocation2 + $0x50] sm:$0xff] }
 0x148   : > { %725 = vst.msk [vmem:[#allocation3 + $0x28] sm:$0xff] %vm719_vm1, %v708_v49  ;;  %724 = vst.msk [vmem:[#allocation3 + $0x20] sm:$0xff] %vm719_vm1, %v707_v50 }
 0x149   : > { %v686_v53 = vpop.xlane.xlu1 %685  ;;  %v684_v54 = vpop.xlane.xlu0 %683 }
 0x14a   : > { %v710_v55 = vadd.f32 %v686_v53, %v646_v51  ;;  %v709_v56 = vadd.f32 %v684_v54, %v645_v52  ;;  %v389_v51 = vld [vmem:[#allocation2 + $0x48] sm:$0xff] }
 0x14b   : > { %v397_v52 = vld [vmem:[#allocation2 + $0x28] sm:$0xff] }
 0x14c   : > { %727 = vst.msk [vmem:[#allocation3 + $0x38] sm:$0xff] %vm719_vm1, %v710_v55  ;;  %726 = vst.msk [vmem:[#allocation3 + $0x30] sm:$0xff] %vm719_vm1, %v709_v56 }
 0x14d   : > { %v690_v59 = vpop.xlane.xlu1 %689  ;;  %v688_v60 = vpop.xlane.xlu0 %687 }
 0x14e   : > { %v712_v61 = vadd.f32 %v690_v59, %v648_v57  ;;  %v711_v62 = vadd.f32 %v688_v60, %v647_v58  ;;  %v395_v57 = vld [vmem:[#allocation2 + $0x70] sm:$0xff]  ;;  %v387_v58 = vld [vmem:[#allocation2 + $0x68] sm:$0xff] }
 0x150   : > { %729 = vst.msk [vmem:[#allocation3 + $0x48] sm:$0xff] %vm719_vm1, %v712_v61  ;;  %728 = vst.msk [vmem:[#allocation3 + $0x40] sm:$0xff] %vm719_vm1, %v711_v62 }
 0x151   : > { %v694_v1 = vpop.xlane.xlu1 %693  ;;  %v692_v2 = vpop.xlane.xlu0 %691 }
 0x152   : > { %v714_v3 = vadd.f32 %v694_v1, %v650_v63  ;;  %v713_v4 = vadd.f32 %v692_v2, %v649_v0 }
 0x154   : > { %731 = vst.msk [vmem:[#allocation3 + $0x58] sm:$0xff] %vm719_vm1, %v714_v3  ;;  %730 = vst.msk [vmem:[#allocation3 + $0x50] sm:$0xff] %vm719_vm1, %v713_v4 }
 0x155   : > { %v698_v7 = vpop.xlane.xlu1 %697  ;;  %v696_v8 = vpop.xlane.xlu0 %695 }
 0x156   : > { %v716_v9 = vadd.f32 %v698_v7, %v652_v5  ;;  %v715_v10 = vadd.f32 %v696_v8, %v651_v6 }
 0x158   : > { %733 = vst.msk [vmem:[#allocation3 + $0x68] sm:$0xff] %vm719_vm1, %v716_v9  ;;  %732 = vst.msk [vmem:[#allocation3 + $0x60] sm:$0xff] %vm719_vm1, %v715_v10 }
 0x15b   : > { %v702_v13 = vpop.xlane.xlu1 %701  ;;  %v700_v14 = vpop.xlane.xlu0 %699 }
 0x15c   : > { %v718_v15 = vadd.f32 %v702_v13, %v654_v11  ;;  %v717_v16 = vadd.f32 %v700_v14, %v653_v12 }
 0x15e   : > { %735 = vst.msk [vmem:[#allocation3 + $0x78] sm:$0xff] %vm719_vm1, %v718_v15  ;;  %734 = vst.msk [vmem:[#allocation3 + $0x70] sm:$0xff] %vm719_vm1, %v717_v16 }
 0x190   : > { %v1553_v19 = vpop.f32.mrf.mxu0  ;;  %v1561_v20 = vpop.f32.mrf.mxu1 }
 0x191   : > { %v609_v23 = vadd.f32 %v1553_v19, %v384_v17  ;;  %v617_v24 = vadd.f32 %v1561_v20, %v392_v18 }
 0x192   : > { %v576_v25 = vpop.f32.mrf.mxu1  ;;  %v544_v26 = vpop.f32.mrf.mxu0 }
 0x193   : > { %625 = vst [vmem:[#allocation2 + $0x58] sm:$0xff] %v609_v23  ;;  %633 = vst [vmem:[#allocation2 + $0x10] sm:$0xff] %v617_v24  ;;  %v615_v29 = vadd.f32 %v576_v25, %v390_v21  ;;  %v607_v30 = vadd.f32 %v544_v26, %v382_v22 }
 0x194   : > { %v1554_v31 = vpop.f32.mrf.mxu0  ;;  %v1562_v32 = vpop.f32.mrf.mxu1 }
 0x195   : > { %631 = vst [vmem:[#allocation2 + $0x40] sm:$0xff] %v615_v29  ;;  %623 = vst [vmem:[#allocation2 + $0x30] sm:$0xff] %v607_v30  ;;  %v610_v35 = vadd.f32 %v1554_v31, %v385_v27  ;;  %v618_v36 = vadd.f32 %v1562_v32, %v393_v28 }
 0x196   : > { %v579_v37 = vpop.f32.mrf.mxu1  ;;  %v547_v38 = vpop.f32.mrf.mxu0 }
 0x197   : > { %626 = vst [vmem:[#allocation2 + $0x18] sm:$0xff] %v610_v35  ;;  %634 = vst [vmem:[#allocation2 + $0x38] sm:$0xff] %v618_v36  ;;  %v616_v41 = vadd.f32 %v579_v37, %v391_v33  ;;  %v608_v42 = vadd.f32 %v547_v38, %v383_v34 }
 0x198   : > { %v1557_v43 = vpop.f32.mrf.mxu0  ;;  %v1565_v44 = vpop.f32.mrf.mxu1 }
 0x199   : > { %632 = vst [vmem:[#allocation2 + $0x20] sm:$0xff] %v616_v41  ;;  %624 = vst [vmem:[#allocation2] sm:$0xff] %v608_v42  ;;  %v613_v47 = vadd.f32 %v1557_v43, %v388_v39  ;;  %v621_v48 = vadd.f32 %v1565_v44, %v396_v40 }
 0x19a   : > { %v592_v49 = vpop.f32.mrf.mxu1  ;;  %v560_v50 = vpop.f32.mrf.mxu0 }
 0x19b   : > { %629 = vst [vmem:[#allocation2 + $0x8] sm:$0xff] %v613_v47  ;;  %637 = vst [vmem:[#allocation2 + $0x78] sm:$0xff] %v621_v48  ;;  %v619_v53 = vadd.f32 %v592_v49, %v394_v45  ;;  %v611_v54 = vadd.f32 %v560_v50, %v386_v46 }
 0x19c   : > { %v1558_v55 = vpop.f32.mrf.mxu0  ;;  %v1566_v56 = vpop.f32.mrf.mxu1 }
 0x19d   : > { %635 = vst [vmem:[#allocation2 + $0x60] sm:$0xff] %v619_v53  ;;  %627 = vst [vmem:[#allocation2 + $0x50] sm:$0xff] %v611_v54  ;;  %v614_v59 = vadd.f32 %v1558_v55, %v389_v51  ;;  %v622_v60 = vadd.f32 %v1566_v56, %v397_v52  ;;  %739 = sbr.rel (%p1445_p2) target bundleno = 680 (0x2a8), region = 60 }
 0x19e   : > { %v595_v61 = vpop.f32.mrf.mxu1  ;;  %v563_v62 = vpop.f32.mrf.mxu0 }
 0x19f   : > { %630 = vst [vmem:[#allocation2 + $0x48] sm:$0xff] %v614_v59  ;;  %638 = vst [vmem:[#allocation2 + $0x28] sm:$0xff] %v622_v60  ;;  %v620_v63 = vadd.f32 %v595_v61, %v395_v57  ;;  %v612_v0 = vadd.f32 %v563_v62, %v387_v58 }
 0x1a1   : > { %636 = vst [vmem:[#allocation2 + $0x70] sm:$0xff] %v620_v63  ;;  %628 = vst [vmem:[#allocation2 + $0x68] sm:$0xff] %v612_v0 }
 0x1a2   : > { %v851_v1 = vld [vmem:[#allocation10 + $0xf8] sm:$0xff]  ;;  %v850_v3 = vld [vmem:[#allocation10 + $0xf0] sm:$0xff]  ;;  %v849_v5 = vld [vmem:[#allocation10 + $0xe8] sm:$0xff]  ;;  %v2185_v62 = vmov 0  }
 0x1a3   : > { %v819_v2 = vld [vmem:[#allocation10 + $0x78] sm:$0xff]  ;;  %1567 = vmatprep.subr.mxu0 %v851_v1  ;;  %v818_v4 = vld [vmem:[#allocation10 + $0x70] sm:$0xff]  ;;  %v817_v6 = vld [vmem:[#allocation10 + $0x68] sm:$0xff]  ;;  %1875 = vset.pattern.permute.xlu1 %v2185_v62 }
 0x1a4   : > { %1623 = vmatprep.subr.mxu1 %v819_v2  ;;  %1568 = vmatpush3.msra.mxu0 %v851_v1  ;;  %v848_v7 = vld [vmem:[#allocation10 + $0xe0] sm:$0xff]  ;;  %v847_v9 = vld [vmem:[#allocation10 + $0xd8] sm:$0xff]  ;;  %v846_v11 = vld [vmem:[#allocation10 + $0xd0] sm:$0xff] }
 0x1a5   : > { %1624 = vmatpush3.msra.mxu1 %v819_v2  ;;  %1569 = vmatprep.subr.mxu0 %v850_v3  ;;  %v816_v8 = vld [vmem:[#allocation10 + $0x60] sm:$0xff]  ;;  %v815_v10 = vld [vmem:[#allocation10 + $0x58] sm:$0xff]  ;;  %v814_v12 = vld [vmem:[#allocation10 + $0x50] sm:$0xff] }
 0x1a6   : > { %1625 = vmatprep.subr.mxu1 %v818_v4  ;;  %1570 = vmatpush3.msra.mxu0 %v850_v3  ;;  %v845_v13 = vld [vmem:[#allocation10 + $0xc8] sm:$0xff]  ;;  %v844_v15 = vld [vmem:[#allocation10 + $0xc0] sm:$0xff]  ;;  %v843_v17 = vld [vmem:[#allocation10 + $0xb8] sm:$0xff] }
 0x1a7   : > { %1626 = vmatpush3.msra.mxu1 %v818_v4  ;;  %1571 = vmatprep.subr.mxu0 %v849_v5  ;;  %v813_v14 = vld [vmem:[#allocation10 + $0x48] sm:$0xff]  ;;  %v812_v16 = vld [vmem:[#allocation10 + $0x40] sm:$0xff]  ;;  %v811_v18 = vld [vmem:[#allocation10 + $0x38] sm:$0xff] }
 0x1a8   : > { %1627 = vmatprep.subr.mxu1 %v817_v6  ;;  %1572 = vmatpush3.msra.mxu0 %v849_v5  ;;  %v842_v19 = vld [vmem:[#allocation10 + $0xb0] sm:$0xff]  ;;  %v841_v21 = vld [vmem:[#allocation10 + $0xa8] sm:$0xff]  ;;  %v840_v23 = vld [vmem:[#allocation10 + $0xa0] sm:$0xff] }
 0x1a9   : > { %1628 = vmatpush3.msra.mxu1 %v817_v6  ;;  %1573 = vmatprep.subr.mxu0 %v848_v7  ;;  %v810_v20 = vld [vmem:[#allocation10 + $0x30] sm:$0xff]  ;;  %v809_v22 = vld [vmem:[#allocation10 + $0x28] sm:$0xff]  ;;  %v808_v24 = vld [vmem:[#allocation10 + $0x20] sm:$0xff] }
 0x1aa   : > { %1629 = vmatprep.subr.mxu1 %v816_v8  ;;  %1574 = vmatpush3.msra.mxu0 %v848_v7  ;;  %v839_v25 = vld [vmem:[#allocation10 + $0x98] sm:$0xff]  ;;  %v742_v26 = vld [vmem:[#allocation3 + $0x10] sm:$0xff]  ;;  %v740_v27 = vld [vmem:[#allocation3] sm:$0xff] }
 0x1ab   : > { %1630 = vmatpush3.msra.mxu1 %v816_v8  ;;  %1575 = vmatprep.subr.mxu0 %v847_v9  ;;  %v807_v28 = vld [vmem:[#allocation10 + $0x18] sm:$0xff]  ;;  %v758_v29 = vadd.f32 1.0, %v742_v26  ;;  %v756_v30 = vadd.f32 1.0, %v740_v27  ;;  %v741_v32 = vld [vmem:[#allocation3 + $0x8] sm:$0xff]  ;;  %v838_v34 = vld [vmem:[#allocation10 + $0x90] sm:$0xff] }
 0x1ac   : > { %1631 = vmatprep.subr.mxu1 %v815_v10  ;;  %1576 = vmatpush3.msra.mxu0 %v847_v9  ;;  %v743_v31 = vld [vmem:[#allocation3 + $0x18] sm:$0xff]  ;;  %v806_v35 = vld [vmem:[#allocation10 + $0x10] sm:$0xff]  ;;  %v757_v36 = vadd.f32 1.0, %v741_v32  ;;  %v745_v37 = vld [vmem:[#allocation3 + $0x28] sm:$0xff] }
 0x1ad   : > { %1632 = vmatpush3.msra.mxu1 %v815_v10  ;;  %1577 = vmatprep.subr.mxu0 %v846_v11  ;;  %v759_v33 = vadd.f32 1.0, %v743_v31  ;;  %1876 = vrcp.f32 %v758_v29  ;;  %v744_v38 = vld [vmem:[#allocation3 + $0x20] sm:$0xff]  ;;  %v837_v39 = vld [vmem:[#allocation10 + $0x88] sm:$0xff]  ;;  %v761_v41 = vadd.f32 1.0, %v745_v37  ;;  %v747_v45 = vld [vmem:[#allocation3 + $0x38] sm:$0xff] }
 0x1ae   : > { %1633 = vmatprep.subr.mxu1 %v814_v12  ;;  %1578 = vmatpush3.msra.mxu0 %v846_v11  ;;  %1878 = vrcp.f32 %v756_v30  ;;  %v805_v40 = vld [vmem:[#allocation10 + $0x8] sm:$0xff]  ;;  %v836_v42 = vld [vmem:[#allocation10 + $0x80] sm:$0xff]  ;;  %v760_v44 = vadd.f32 1.0, %v744_v38  ;;  %v820_v46 = vld [vmem:[#allocation2 + $0x30] sm:$0xff]  ;;  %v763_v51 = vadd.f32 1.0, %v747_v45 }
 0x1af   : > { %1634 = vmatpush3.msra.mxu1 %v814_v12  ;;  %1579 = vmatprep.subr.mxu0 %v845_v13  ;;  %1880 = vrcp.f32 %v759_v33  ;;  %v804_v43 = vld [vmem:[#allocation10] sm:$0xff]  ;;  %v746_v47 = vld [vmem:[#allocation3 + $0x30] sm:$0xff]  ;;  %v789_v50 = vld [vmem:[%s2463_s2 + $0x8] sm:$0xff] }
 0x1b0   : > { %1635 = vmatprep.subr.mxu1 %v813_v14  ;;  %1580 = vmatpush3.msra.mxu0 %v845_v13  ;;  %1882 = vrcp.f32 %v757_v36  ;;  %v788_v48 = vld [vmem:[%s2463_s2] sm:$0xff]  ;;  %v822_v52 = vld [vmem:[#allocation2 + $0x58] sm:$0xff]  ;;  %v790_v53 = vld [vmem:[%s2463_s2 + $0x10] sm:$0xff]  ;;  %v762_v54 = vadd.f32 1.0, %v746_v47 }
 0x1b1   : > { %1636 = vmatpush3.msra.mxu1 %v813_v14  ;;  %1581 = vmatprep.subr.mxu0 %v844_v15  ;;  %v821_v49 = vld [vmem:[#allocation2] sm:$0xff]  ;;  %1884 = vrcp.f32 %v761_v41  ;;  %v749_v55 = vld [vmem:[#allocation3 + $0x48] sm:$0xff]  ;;  %v823_v57 = vld [vmem:[#allocation2 + $0x18] sm:$0xff] }
 0x1b2   : > { %1637 = vmatprep.subr.mxu1 %v812_v16  ;;  %1582 = vmatpush3.msra.mxu0 %v844_v15  ;;  %1886 = vrcp.f32 %v760_v44  ;;  %v748_v56 = vld [vmem:[#allocation3 + $0x40] sm:$0xff]  ;;  %v791_v58 = vld [vmem:[%s2463_s2 + $0x18] sm:$0xff]  ;;  %v765_v59 = vadd.f32 1.0, %v749_v55  ;;  %v824_v60 = vld [vmem:[#allocation2 + $0x50] sm:$0xff] }
 0x1b3   : > { %1638 = vmatpush3.msra.mxu1 %v812_v16  ;;  %1583 = vmatprep.subr.mxu0 %v843_v17  ;;  %1888 = vrcp.f32 %v763_v51  ;;  %v792_v61 = vld [vmem:[%s2463_s2 + $0x20] sm:$0xff]  ;;  %v764_v63 = vadd.f32 1.0, %v748_v56  ;;  %v751_v0 = vld [vmem:[#allocation3 + $0x58] sm:$0xff]  ;;  %v750_v2 = vld [vmem:[#allocation3 + $0x50] sm:$0xff] }
 0x1b4   : > { %1639 = vmatprep.subr.mxu1 %v811_v18  ;;  %1584 = vmatpush3.msra.mxu0 %v843_v17  ;;  %1890 = vrcp.f32 %v762_v54  ;;  %v825_v4 = vld [vmem:[#allocation2 + $0x68] sm:$0xff]  ;;  %v767_v6 = vadd.f32 1.0, %v751_v0  ;;  %v794_v9 = vld [vmem:[%s2463_s2 + $0x30] sm:$0xff]  ;;  %v766_v10 = vadd.f32 1.0, %v750_v2  ;;  %v752_v13 = vld [vmem:[#allocation3 + $0x60] sm:$0xff] }
 0x1b5   : > { %1640 = vmatpush3.msra.mxu1 %v811_v18  ;;  %1585 = vmatprep.subr.mxu0 %v842_v19  ;;  %v793_v5 = vld [vmem:[%s2463_s2 + $0x28] sm:$0xff]  ;;  %1892 = vrcp.f32 %v765_v59  ;;  %v795_v15 = vld [vmem:[%s2463_s2 + $0x38] sm:$0xff]  ;;  %v828_v18 = vld [vmem:[#allocation2 + $0x40] sm:$0xff] }
 0x1b6   : > { %1641 = vmatprep.subr.mxu1 %v810_v20  ;;  %1586 = vmatpush3.msra.mxu0 %v842_v19  ;;  %v826_v8 = vld [vmem:[#allocation2 + $0x8] sm:$0xff]  ;;  %1894 = vrcp.f32 %v764_v63  ;;  %v796_v19 = vld [vmem:[%s2463_s2 + $0x40] sm:$0xff]  ;;  %v798_v29 = vld [vmem:[%s2463_s2 + $0x50] sm:$0xff] }
 0x1b7   : > { %1642 = vmatpush3.msra.mxu1 %v810_v20  ;;  %1587 = vmatprep.subr.mxu0 %v841_v21  ;;  %v753_v11 = vld [vmem:[#allocation3 + $0x68] sm:$0xff]  ;;  %1896 = vrcp.f32 %v767_v6  ;;  %v768_v20 = vadd.f32 1.0, %v752_v13  ;;  %v831_v32 = vld [vmem:[#allocation2 + $0x38] sm:$0xff]  ;;  %v800_v36 = vld [vmem:[%s2463_s2 + $0x60] sm:$0xff] }
 0x1b8   : > { %1643 = vmatprep.subr.mxu1 %v809_v22  ;;  %1588 = vmatpush3.msra.mxu0 %v841_v21  ;;  %v827_v14 = vld [vmem:[#allocation2 + $0x48] sm:$0xff]  ;;  %v769_v16 = vadd.f32 1.0, %v753_v11  ;;  %1898 = vrcp.f32 %v766_v10  ;;  %v755_v21 = vld [vmem:[#allocation3 + $0x78] sm:$0xff]  ;;  %v833_v38 = vld [vmem:[#allocation2 + $0x70] sm:$0xff] }
 0x1b9   : > { %1644 = vmatpush3.msra.mxu1 %v809_v22  ;;  %1589 = vmatprep.subr.mxu0 %v840_v23  ;;  %v771_v26 = vadd.f32 1.0, %v755_v21  ;;  %v799_v33 = vld [vmem:[%s2463_s2 + $0x58] sm:$0xff]  ;;  %v835_v44 = vld [vmem:[#allocation2 + $0x28] sm:$0xff] }
 0x1ba   : > { %1645 = vmatprep.subr.mxu1 %v808_v24  ;;  %1590 = vmatpush3.msra.mxu0 %v840_v23  ;;  %v1877_v1 = vpop.eup %1876  ;;  %v754_v23 = vld [vmem:[#allocation3 + $0x70] sm:$0xff]  ;;  %1900 = vrcp.f32 %v769_v16  ;;  %v834_v41 = vld [vmem:[#allocation2 + $0x78] sm:$0xff] }
 0x1bb   : > { %1646 = vmatpush3.msra.mxu1 %v808_v24  ;;  %1591 = vmatprep.subr.mxu0 %v839_v25  ;;  %v1879_v3 = vpop.eup %1878  ;;  %v829_v24 = vld [vmem:[#allocation2 + $0x20] sm:$0xff]  ;;  %1902 = vrcp.f32 %v768_v20  ;;  %v770_v30 = vadd.f32 1.0, %v754_v23  ;;  %v803_v45 = vld [vmem:[%s2463_s2 + $0x78] sm:$0xff] }
 0x1bc   : > { %1647 = vmatprep.subr.mxu1 %v807_v28  ;;  %1592 = vmatpush3.msra.mxu0 %v839_v25  ;;  %v1881_v7 = vpop.eup %1880  ;;  %v797_v25 = vld [vmem:[%s2463_s2 + $0x48] sm:$0xff]  ;;  %1904 = vrcp.f32 %v771_v26 }
 0x1bd   : > { %1648 = vmatpush3.msra.mxu1 %v807_v28  ;;  %1593 = vmatprep.subr.mxu0 %v838_v34  ;;  %v1883_v12 = vpop.eup %1882  ;;  %v830_v28 = vld [vmem:[#allocation2 + $0x10] sm:$0xff]  ;;  %1906 = vrcp.f32 %v770_v30 }
 0x1be   : > { %1649 = vmatprep.subr.mxu1 %v806_v35  ;;  %1594 = vmatpush3.msra.mxu0 %v838_v34  ;;  %v1885_v17 = vpop.eup %1884 }
 0x1bf   : > { %1650 = vmatpush3.msra.mxu1 %v806_v35  ;;  %1595 = vmatprep.subr.mxu0 %v837_v39  ;;  %v1887_v22 = vpop.eup %1886  ;;  %v832_v35 = vld [vmem:[#allocation2 + $0x60] sm:$0xff] }
 0x1c0   : > { %1651 = vmatprep.subr.mxu1 %v805_v40  ;;  %1596 = vmatpush3.msra.mxu0 %v837_v39  ;;  %v1889_v27 = vpop.eup %1888  ;;  %v801_v39 = vld [vmem:[%s2463_s2 + $0x68] sm:$0xff] }
 0x1c1   : > { %1652 = vmatpush3.msra.mxu1 %v805_v40  ;;  %1597 = vmatprep.subr.mxu0 %v836_v42  ;;  %v1891_v31 = vpop.eup %1890 }
 0x1c2   : > { %1653 = vmatprep.subr.mxu1 %v804_v43  ;;  %1598 = vmatpush3.msra.mxu0 %v836_v42  ;;  %v1893_v34 = vpop.eup %1892  ;;  %v802_v42 = vld [vmem:[%s2463_s2 + $0x70] sm:$0xff] }
 0x1c3   : > { %1599 = vmatprep.mubr.f32.mxu0 %v820_v46  ;;  %1654 = vmatpush3.msra.mxu1 %v804_v43  ;;  %v1895_v37 = vpop.eup %1894 }
 0x1c4   : > { %1655 = vmatprep.mubr.f32.mxu1 %v788_v48  ;;  %1600 = vmatmul.mubr.f32.vlgmr.msra.gmra.mxu0 %v821_v49  ;;  %v1897_v40 = vpop.eup %1896 }
 0x1c5   : > { %1656 = vmatmul.mubr.f32.vlgmr.msra.gmra.mxu1 %v789_v50  ;;  %1602 = vmatprep.mubr.f32.mxu0 %v822_v52  ;;  %v1899_v43 = vpop.eup %1898 }
 0x1c6   : > { %1658 = vmatprep.mubr.f32.mxu1 %v790_v53  ;;  %1874 = vset.pattern.permute.xlu0 %v2185_v62 }
 0x1c7   : > { %1009 = vperm.xlu1 %1875, %v1877_v1   ;;  %999 = vperm.xlu0 %1874, %v1879_v3   ;;  %v1901_v46 = vpop.eup %1900 }
 0x1c8   : > { %1603 = vmatmul.mubr.f32.gmra.mxu0 %v823_v57  ;;  %v1903_v47 = vpop.eup %1902 }
 0x1c9   : > { %1659 = vmatmul.mubr.f32.gmra.mxu1 %v791_v58  ;;  %1605 = vmatprep.mubr.f32.mxu0 %v824_v60  ;;  %v1905_v48 = vpop.eup %1904 }
 0x1ca   : > { %1661 = vmatprep.mubr.f32.mxu1 %v792_v61  ;;  %v1907_v49 = vpop.eup %1906 }
 0x1cb   : > { %1014 = vperm.xlu1 %1875, %v1881_v7   ;;  %1004 = vperm.xlu0 %1874, %v1883_v12  }
 0x1cc   : > { %1606 = vmatmul.mubr.f32.gmra.mxu0 %v825_v4 }
 0x1cd   : > { %1662 = vmatmul.mubr.f32.gmra.mxu1 %v793_v5  ;;  %1608 = vmatprep.mubr.f32.mxu0 %v826_v8 }
 0x1ce   : > { %1664 = vmatprep.mubr.f32.mxu1 %v794_v9 }
 0x1cf   : > { %1024 = vperm.xlu1 %1875, %v1885_v17   ;;  %1019 = vperm.xlu0 %1874, %v1887_v22  }
 0x1d0   : > { %1609 = vmatmul.mubr.f32.gmra.mxu0 %v827_v14 }
 0x1d1   : > { %1665 = vmatmul.mubr.f32.gmra.mxu1 %v795_v15  ;;  %1611 = vmatprep.mubr.f32.mxu0 %v828_v18 }
 0x1d2   : > { %1667 = vmatprep.mubr.f32.mxu1 %v796_v19 }
 0x1d3   : > { %1034 = vperm.xlu1 %1875, %v1889_v27   ;;  %1029 = vperm.xlu0 %1874, %v1891_v31  }
 0x1d4   : > { %1612 = vmatmul.mubr.f32.gmra.mxu0 %v829_v24 }
 0x1d5   : > { %1668 = vmatmul.mubr.f32.gmra.mxu1 %v797_v25  ;;  %1614 = vmatprep.mubr.f32.mxu0 %v830_v28 }
 0x1d6   : > { %1670 = vmatprep.mubr.f32.mxu1 %v798_v29 }
 0x1d7   : > { %1044 = vperm.xlu1 %1875, %v1893_v34   ;;  %1039 = vperm.xlu0 %1874, %v1895_v37  }
 0x1d8   : > { %1615 = vmatmul.mubr.f32.gmra.mxu0 %v831_v32 }
 0x1d9   : > { %1671 = vmatmul.mubr.f32.gmra.mxu1 %v799_v33  ;;  %1617 = vmatprep.mubr.f32.mxu0 %v832_v35 }
 0x1da   : > { %1673 = vmatprep.mubr.f32.mxu1 %v800_v36 }
 0x1db   : > { %1054 = vperm.xlu1 %1875, %v1897_v40   ;;  %1049 = vperm.xlu0 %1874, %v1899_v43  }
 0x1dc   : > { %1618 = vmatmul.mubr.f32.gmra.mxu0 %v833_v38 }
 0x1dd   : > { %1674 = vmatmul.mubr.f32.gmra.mxu1 %v801_v39  ;;  %1620 = vmatprep.mubr.f32.mxu0 %v834_v41 }
 0x1de   : > { %1676 = vmatprep.mubr.f32.mxu1 %v802_v42 }
 0x1df   : > { %1064 = vperm.xlu1 %1875, %v1901_v46   ;;  %1059 = vperm.xlu0 %1874, %v1903_v47  }
 0x1e0   : > { %1621 = vmatmul.mubr.f32.gmra.mxu0 %v835_v44 }
 0x1e1   : > { %1677 = vmatmul.mubr.f32.gmra.mxu1 %v803_v45 }
 0x1e3   : > { %1074 = vperm.xlu1 %1875, %v1905_v48   ;;  %1069 = vperm.xlu0 %1874, %v1907_v49  }
 0x242   : > { %v1010_v50 = vpop.permute.xlu1 %1009  ;;  %v1000_v51 = vpop.permute.xlu0 %999 }
 0x246   : > { %v1015_v52 = vpop.permute.xlu1 %1014  ;;  %v1005_v53 = vpop.permute.xlu0 %1004 }
 0x24a   : > { %v1025_v54 = vpop.permute.xlu1 %1024  ;;  %v1020_v55 = vpop.permute.xlu0 %1019 }
 0x24e   : > { %v1035_v61 = vpop.permute.xlu1 %1034  ;;  %v1030_v2 = vpop.permute.xlu0 %1029 }
 0x252   : > { %v1045_v11 = vpop.permute.xlu1 %1044  ;;  %v1040_v16 = vpop.permute.xlu0 %1039 }
 0x256   : > { %v1055_v25 = vpop.permute.xlu1 %1054  ;;  %v1050_v30 = vpop.permute.xlu0 %1049 }
 0x25a   : > { %v1065_v39 = vpop.permute.xlu1 %1064  ;;  %v1060_v44 = vpop.permute.xlu0 %1059 }
 0x284   : > { %v1601_v56 = vpop.f32.mrf.mxu0 }
 0x285   : > { %v1657_v57 = vpop.f32.mrf.mxu1  ;;  %v1078_v58 = vmul.f32 %v1601_v56, %v1005_v53  ;;  %v1075_v53 = vpop.permute.xlu1 %1074 }
 0x286   : > { %v918_v59 = vpop.f32.mrf.mxu0 }
 0x287   : > { %v1159_v60 = vpop.f32.mrf.mxu1  ;;  %v1165_v62 = vadd.f32 %v1657_v57, %v1078_v58  ;;  %v1077_v63 = vmul.f32 %v1000_v51, %v918_v59 }
 0x288   : > { %v1604_v0 = vpop.f32.mrf.mxu0 }
 0x289   : > { %v1660_v1 = vpop.f32.mrf.mxu1  ;;  %1239 = vst [vmem:[%s2488_s8 + $0x8] sm:$0xff] %v1165_v62  ;;  %v1160_v3 = vadd.f32 %v1159_v60, %v1077_v63  ;;  %v1080_v4 = vmul.f32 %v1604_v0, %v1015_v52  ;;  %v1070_v60 = vpop.permute.xlu0 %1069 }
 0x28a   : > { %v928_v5 = vpop.f32.mrf.mxu0 }
 0x28b   : > { %v1169_v6 = vpop.f32.mrf.mxu1  ;;  %1238 = vst [vmem:[%s2488_s8] sm:$0xff] %v1160_v3  ;;  %v1175_v7 = vadd.f32 %v1660_v1, %v1080_v4  ;;  %v1079_v8 = vmul.f32 %v1010_v50, %v928_v5 }
 0x28c   : > { %v1607_v9 = vpop.f32.mrf.mxu0 }
 0x28d   : > { %v1663_v10 = vpop.f32.mrf.mxu1  ;;  %1241 = vst [vmem:[%s2488_s8 + $0x18] sm:$0xff] %v1175_v7  ;;  %v1170_v12 = vadd.f32 %v1169_v6, %v1079_v8  ;;  %v1082_v13 = vmul.f32 %v1607_v9, %v1025_v54 }
 0x28e   : > { %v938_v14 = vpop.f32.mrf.mxu0 }
 0x28f   : > { %v1179_v15 = vpop.f32.mrf.mxu1  ;;  %1240 = vst [vmem:[%s2488_s8 + $0x10] sm:$0xff] %v1170_v12  ;;  %v1185_v17 = vadd.f32 %v1663_v10, %v1082_v13  ;;  %v1081_v18 = vmul.f32 %v1020_v55, %v938_v14 }
 0x290   : > { %v1610_v19 = vpop.f32.mrf.mxu0 }
 0x291   : > { %v1666_v20 = vpop.f32.mrf.mxu1  ;;  %1243 = vst [vmem:[%s2488_s8 + $0x28] sm:$0xff] %v1185_v17  ;;  %v1180_v21 = vadd.f32 %v1179_v15, %v1081_v18  ;;  %v1084_v22 = vmul.f32 %v1610_v19, %v1035_v61 }
 0x292   : > { %v948_v23 = vpop.f32.mrf.mxu0 }
 0x293   : > { %v1189_v24 = vpop.f32.mrf.mxu1  ;;  %1242 = vst [vmem:[%s2488_s8 + $0x20] sm:$0xff] %v1180_v21  ;;  %v1195_v26 = vadd.f32 %v1666_v20, %v1084_v22  ;;  %v1083_v27 = vmul.f32 %v1030_v2, %v948_v23 }
 0x294   : > { %v1613_v28 = vpop.f32.mrf.mxu0 }
 0x295   : > { %v1669_v29 = vpop.f32.mrf.mxu1  ;;  %1245 = vst [vmem:[%s2488_s8 + $0x38] sm:$0xff] %v1195_v26  ;;  %v1190_v31 = vadd.f32 %v1189_v24, %v1083_v27  ;;  %v1086_v32 = vmul.f32 %v1613_v28, %v1045_v11 }
 0x296   : > { %v958_v33 = vpop.f32.mrf.mxu0 }
 0x297   : > { %v1199_v34 = vpop.f32.mrf.mxu1  ;;  %1244 = vst [vmem:[%s2488_s8 + $0x30] sm:$0xff] %v1190_v31  ;;  %v1205_v35 = vadd.f32 %v1669_v29, %v1086_v32  ;;  %v1085_v36 = vmul.f32 %v1040_v16, %v958_v33 }
 0x298   : > { %v1616_v37 = vpop.f32.mrf.mxu0 }
 0x299   : > { %v1672_v38 = vpop.f32.mrf.mxu1  ;;  %1247 = vst [vmem:[%s2488_s8 + $0x48] sm:$0xff] %v1205_v35  ;;  %v1200_v40 = vadd.f32 %v1199_v34, %v1085_v36  ;;  %v1088_v41 = vmul.f32 %v1616_v37, %v1055_v25 }
 0x29a   : > { %v968_v42 = vpop.f32.mrf.mxu0 }
 0x29b   : > { %v1209_v43 = vpop.f32.mrf.mxu1  ;;  %1246 = vst [vmem:[%s2488_s8 + $0x40] sm:$0xff] %v1200_v40  ;;  %v1215_v45 = vadd.f32 %v1672_v38, %v1088_v41  ;;  %v1087_v46 = vmul.f32 %v1050_v30, %v968_v42 }
 0x29c   : > { %v1619_v47 = vpop.f32.mrf.mxu0 }
 0x29d   : > { %v1675_v48 = vpop.f32.mrf.mxu1  ;;  %1249 = vst [vmem:[%s2488_s8 + $0x58] sm:$0xff] %v1215_v45  ;;  %v1210_v49 = vadd.f32 %v1209_v43, %v1087_v46  ;;  %v1090_v50 = vmul.f32 %v1619_v47, %v1065_v39 }
 0x29e   : > { %v978_v51 = vpop.f32.mrf.mxu0 }
 0x29f   : > { %v1219_v52 = vpop.f32.mrf.mxu1  ;;  %1248 = vst [vmem:[%s2488_s8 + $0x50] sm:$0xff] %v1210_v49  ;;  %v1225_v54 = vadd.f32 %v1675_v48, %v1090_v50  ;;  %v1089_v55 = vmul.f32 %v1060_v44, %v978_v51 }
 0x2a0   : > { %v1622_v56 = vpop.f32.mrf.mxu0 }
 0x2a1   : > { %v1678_v57 = vpop.f32.mrf.mxu1  ;;  %1251 = vst [vmem:[%s2488_s8 + $0x68] sm:$0xff] %v1225_v54  ;;  %v1220_v58 = vadd.f32 %v1219_v52, %v1089_v55  ;;  %v1092_v59 = vmul.f32 %v1622_v56, %v1075_v53 }
 0x2a2   : > { %v988_v61 = vpop.f32.mrf.mxu0 }
 0x2a3   : > { %1250 = vst [vmem:[%s2488_s8 + $0x60] sm:$0xff] %v1220_v58  ;;  %v1235_v62 = vadd.f32 %v1678_v57, %v1092_v59  ;;  %v1091_v63 = vmul.f32 %v1070_v60, %v988_v61  ;;  %v1229_v0 = vpop.f32.mrf.mxu1 }
 0x2a5   : > { %1253 = vst [vmem:[%s2488_s8 + $0x78] sm:$0xff] %v1235_v62  ;;  %v1230_v1 = vadd.f32 %v1229_v0, %v1091_v63 }
 0x2a7   : > { %1252 = vst [vmem:[%s2488_s8 + $0x70] sm:$0xff] %v1230_v1 }
 0x2a8 PF: > { %s2720_s29 = sld [smem:[#allocation22_spill]]  ;;  %s1268_s4 = sshll.u32 %s2488_s8, 4  ;;  %s2579_s4 = int_to_ptr.vmem [resolvable:$true] %s1268_s4 }
 0x2a9   : > { %s2721_s14 = sld [smem:[#allocation32_spill]]  ;;  %s1255_s2 = scalar_lea.sflag [#allocation6], %s2459_s25 }
 0x2aa   : > { %s2018_s10 = scalar_lea.vmem %s2579_s4, 2048  ;;  %s2186_s30 = smov [#allocation12]  }
 0x2ab   : > { %p2019_p9 = scmp.ne.s32.totalorder %s2579_s4, %s2018_s10  ;;  %s2022_s15 = sshll.u32 %s2186_s30, 4  ;;  %s2023_s15 = int_to_ptr.vmem [resolvable:$false] %s2022_s15 }
 0x2ac   : > { %s2024_s1 = scalar_lea.vmem %s2023_s15, 4096  ;;  %p2025_p10 = scmp.lt.s32.totalorder %s2579_s4, %s2023_s15 }
 0x2ad   : > { %p2020_p12 = pnand %p2019_p9, %p2393_p5  ;;  %p2026_p7 = scmp.lt.s32.totalorder %s2024_s1, %s2018_s10 }
 0x2ae   : > { %s1454_s24 = sshll.u32 %s2720_s29, 11 }
 0x2af   : > { %s2576_s3 = scalar_lea.hbm %s2721_s14, %s1454_s24  ;;  %p2021_p1 = pneg %p2020_p12 }
 0x2b0   : > { %p2027_p11 = por %p2026_p7, %p2025_p10 }
 0x2b2   : > { %p2028_p8 = pnand %p2027_p11, %p2021_p1 }
 0x2b4   : > { %2031 = shalt.err (!%p2028_p8)
}
 0x2b5   : > { %s2032_s6 = scalar_lea.hbm %s2576_s3, 2048  ;;  %s2036_s18 = scalar_lea.hbm %s2721_s14, 4096 }
 0x2b6   : > { %p2033_p3 = scmp.ne.s32.totalorder %s2576_s3, %s2032_s6  ;;  %p2037_p4 = scmp.lt.s32.totalorder %s2576_s3, %s2721_s14 }
 0x2b7   : > { %p2038_p13 = scmp.lt.s32.totalorder %s2036_s18, %s2032_s6 }
 0x2b8   : > { %p2034_p6 = pnand %p2033_p3, %p2393_p5 }
 0x2b9   : > { %p2039_p2 = por %p2038_p13, %p2037_p4 }
 0x2ba   : > { %p2035_p0 = pneg %p2034_p6 }
 0x2bc   : > { %p2040_p9 = pnand %p2039_p2, %p2035_p0 }
 0x2be   : > { %2043 = shalt.err (!%p2040_p9)
}
 0x2bf   : > { %s2187_s11 = smov 128   ;;  %s2188_s9 = smov 8  }
 0x2c0   : > { %1705 = dma.vmem_to_hbm [thread:$0]  (%p2393_p5), %s2579_s4, 2048, %s2576_s3, %s1255_s2, %s2187_s11, %s2187_s11, %s2188_s9  }
 0x2c1 PF: > { %p1728_p12 = scmp.ge.s32.totalorder %s2174_s28, 2  ;;  %s1283_s29 = sand.u32 1, %s2146_s21  }
 0x2c2   : > { %p2722_p1 = scmp.ne.s32.totalorder %s2698_s5, 0  ;;  %s1284_s24 = scalar_lea.sflag [#allocation6], %s1283_s29 }
 0x2c4   : > { %p1722_p10 = pnand %p1728_p12, %p2722_p1 }
 0x2c6   : > { %p1723_p7 = pneg %p1722_p10 }
 0x2c8   : > { %2117 = dma.done.wait (%p1723_p7), %s1284_s24, 2048  }
 0x2c9   : > { %2119 = vsyncadd (%p1723_p7), %s1284_s24, 4294965248  ;;  %s24_s28 = sadd.s32 1, %s2174_s28   ;;  %s2724_s15 = sld [smem:[#allocation19_spill]] }
 0x2ca   : > { %p2609_p11 = scmp.ge.s32.totalorder %s24_s28, 6   ;;  %s2725_s13 = sld [smem:[#allocation26_spill]] }
 0x2cb   : > { %s2726_s25 = sld [smem:[#allocation20_spill]]  ;;  %s2731_s16 = smov %s2130_s17 }
 0x2cc   : > { %s2727_s23 = sld [smem:[#allocation27_spill]]  ;;  %s2732_s17 = smov %s2423_s27 }
 0x2cd   : > { %s2728_s5 = sld [smem:[#allocation23_spill]]  ;;  %s2733_s18 = smov %s2138_s19 }
 0x2ce   : > { %s2729_s3 = sld [smem:[#allocation24_spill]]  ;;  %s2734_s19 = smov %s2142_s20 }
 0x2cf   : > { %s2730_s4 = sld [smem:[#allocation25_spill]]  ;;  %s2736_s21 = smov %s2150_s22 }
 0x2d0   : > { %s2735_s20 = smov %s2725_s13  ;;  %s2738_s24 = smov %s2166_s26 }
 0x2d1   : > { %s2737_s22 = smov %s2726_s25  ;;  %23 = sbr.rel (!%p2609_p11) target bundleno = 19 (0x13), region = 117 }
 0x2d3   : > { %s2739_s25 = smov %s2728_s5 }
 0x2d4   : > { %s2740_s26 = smov %s2729_s3 }
 0x2d5   : > { %s2741_s27 = smov %s2730_s4 }
 0x2d6   :  { %1289 = vsyncpa [#allocation5], 1 }
 0x2d7   :  { %1291 = vsyncpa [#allocation5 + $0x1], 1 }
 0x2d8   :  { %1292 = vsyncpa [#allocation8], 1 }
 0x2d9   :  { %1294 = vsyncpa [#allocation8 + $0x1], 1 }
 0x2da   :  { %1295 = vsyncpa [#allocation11], 1 }
 0x2db   :  { %1296 = vsyncpa [#allocation6], 1 }
 0x2dc   :  { %1298 = vsyncpa [#allocation6 + $0x1], 1 }

</bundles_post_ra>
